<compile_context>
chip_gen: v7x
topology: tpu7x:2x2x1
jax: 0.10.0
libtpu: 0.0.40
codegen_flags: <defaults>
</compile_context>

<pallas_src>
import jax
import jax.numpy as jnp
from jax.experimental import pallas as pl
from jax.experimental.pallas import tpu as pltpu

# ---- model hyper-parameters (small, consistent with the module's __init__) ----
NUM_USERS = 16
NUM_ITEMS = 24
NUM_OTHERS = 8
N_NODES = NUM_USERS + NUM_ITEMS + NUM_OTHERS   # 48
LATENT_DIM = 32                                # latent_dim_rec
D_PAD = 128                                    # lane-dense latent layout
N_LAYERS = 3                                   # lgn_layers
BATCH = 8                                      # len(users) == len(items)


def _lightgcn_forward_kernel(u_idx_ref, i_idx_ref, graph_ref, emb0_ref,
                             lgn_ref, gamma_ref):
    """Fused LightGCN propagation + one-hot gather + per-pair dot product.

    u_idx_ref, i_idx_ref : VMEM (B, 1)  int32     user / item indices
    graph_ref            : VMEM (N, N)  bf16      normalized dense adjacency
    emb0_ref             : VMEM (N, Dp) f32       concat'ed layer-0 embeddings (lane padded)
    lgn_ref   (out)      : VMEM (N, Dp) f32       mean-pooled LightGCN embeddings
    gamma_ref (out)      : VMEM (B, 1)  f32       forward() scores
    """
    # ---- LightGCN propagation: E_{l+1} = G @ E_l ; lgn = mean_l E_l ----
    g = graph_ref[...]                      # bf16 (N, N)
    e0 = emb0_ref[...]                      # f32  (N, Dp)
    cur = e0
    acc = e0
    for _ in range(N_LAYERS):               # small static trip count
        cur = jnp.dot(g, cur.astype(jnp.bfloat16),
                      preferred_element_type=jnp.float32)
        acc = acc + cur
    lgn = acc * (1.0 / (N_LAYERS + 1))
    lgn_ref[...] = lgn                       # lane-dense (N, 128) store

    # ---- forward(users, items): vectorized gather via one-hot matmuls ----
    node_iota = jax.lax.broadcasted_iota(jnp.int32, (BATCH, N_NODES), 1)
    onehot_u = jnp.where(node_iota == u_idx_ref[...], 1.0, 0.0)
    onehot_i = jnp.where(node_iota == (i_idx_ref[...] + NUM_USERS), 1.0, 0.0)
    u_e = jnp.dot(onehot_u, lgn, preferred_element_type=jnp.float32)  # (B, Dp)
    i_e = jnp.dot(onehot_i, lgn, preferred_element_type=jnp.float32)  # (B, Dp)
    gamma_ref[...] = jnp.sum(u_e * i_e, axis=-1, keepdims=True)       # (B, 1)


def lightgcn_forward(users, items, graph, emb0):
    """Returns (lgn_out (N, D) f32, gamma (B,) f32)."""
    users2d = users.astype(jnp.int32).reshape(BATCH, 1)
    items2d = items.astype(jnp.int32).reshape(BATCH, 1)
    graph_bf16 = graph.astype(jnp.bfloat16)
    emb0_pad = jnp.pad(emb0, ((0, 0), (0, D_PAD - LATENT_DIM)))

    lgn_pad, gamma2d = pl.pallas_call(
        _lightgcn_forward_kernel,
        out_shape=(
            jax.ShapeDtypeStruct((N_NODES, D_PAD), jnp.float32),
            jax.ShapeDtypeStruct((BATCH, 1), jnp.float32),
        ),
        in_specs=[
            pl.BlockSpec(memory_space=pltpu.MemorySpace.VMEM),  # user indices
            pl.BlockSpec(memory_space=pltpu.MemorySpace.VMEM),  # item indices
            pl.BlockSpec(memory_space=pltpu.MemorySpace.VMEM),  # graph (bf16)
            pl.BlockSpec(memory_space=pltpu.MemorySpace.VMEM),  # emb0 (padded)
        ],
        out_specs=(
            pl.BlockSpec(memory_space=pltpu.MemorySpace.VMEM),  # lgn_out
            pl.BlockSpec(memory_space=pltpu.MemorySpace.VMEM),  # gamma
        ),
    )(users2d, items2d, graph_bf16, emb0_pad)

    return lgn_pad[:, :LATENT_DIM], gamma2d.reshape(BATCH)


def _reference_forward(users, items, graph, emb0):
    """Pure-JAX reference matching the PyTorch compute()/forward() semantics."""
    embs = [emb0]
    cur = emb0
    for _ in range(N_LAYERS):
        cur = jnp.dot(graph, cur, precision=jax.lax.Precision.HIGHEST)
        embs.append(cur)
    lgn = jnp.mean(jnp.stack(embs, axis=1), axis=1)
    u_e = lgn[:NUM_USERS][users]
    i_e = lgn[NUM_USERS:NUM_USERS + NUM_ITEMS][items]
    return lgn, jnp.sum(u_e * i_e, axis=1)


def _build_inputs():
    key = jax.random.PRNGKey(0)
    k_u, k_i, k_o, k_g, k_uid, k_iid = jax.random.split(key, 6)

    # nn.init.normal_(std=0.1) for the three embedding tables.
    user_emb = 0.1 * jax.random.normal(k_u, (NUM_USERS, LATENT_DIM), jnp.float32)
    item_emb = 0.1 * jax.random.normal(k_i, (NUM_ITEMS, LATENT_DIM), jnp.float32)
    other_emb = 0.1 * jax.random.normal(k_o, (NUM_OTHERS, LATENT_DIM), jnp.float32)
    emb0 = jnp.concatenate([user_emb, item_emb, other_emb], axis=0)

    # Synthetic symmetric normalized adjacency D^{-1/2} A D^{-1/2} (dense
    # stand-in for dataset.getSparseGraph()).
    a = (jax.random.uniform(k_g, (N_NODES, N_NODES)) < 0.15).astype(jnp.float32)
    a = jnp.maximum(a, a.T) * (1.0 - jnp.eye(N_NODES, dtype=jnp.float32))
    deg = jnp.sum(a, axis=1)
    d_inv_sqrt = jnp.where(deg > 0, 1.0 / jnp.sqrt(jnp.maximum(deg, 1e-12)), 0.0)
    graph = a * d_inv_sqrt[:, None] * d_inv_sqrt[None, :]

    users = jax.random.randint(k_uid, (BATCH,), 0, NUM_USERS, dtype=jnp.int32)
    items = jax.random.randint(k_iid, (BATCH,), 0, NUM_ITEMS, dtype=jnp.int32)
    return users, items, graph, emb0


if __name__ == "__main__":
    users, items, graph, emb0 = _build_inputs()

    lgn_out, gamma = lightgcn_forward(users, items, graph, emb0)
    jax.block_until_ready(gamma)

    ref_lgn, ref_gamma = _reference_forward(users, items, graph, emb0)
    assert jnp.allclose(lgn_out, ref_lgn, rtol=1e-2, atol=1e-3), "lgn_out mismatch"
    assert jnp.allclose(gamma, ref_gamma, rtol=1e-2, atol=1e-3), "gamma mismatch"

    print("KERNEL_OK")
</pallas_src>

<mosaic_0001>
module attributes {stable_mosaic.version = 11 : i64} {
  func.func @_lightgcn_forward_kernel(%arg0: memref<8x1xi32, #tpu.memory_space<vmem>>, %arg1: memref<8x1xi32, #tpu.memory_space<vmem>>, %arg2: memref<48x48xbf16, #tpu.memory_space<vmem>>, %arg3: memref<48x128xf32, #tpu.memory_space<vmem>>, %arg4: memref<48x128xf32, #tpu.memory_space<vmem>>, %arg5: memref<8x1xf32, #tpu.memory_space<vmem>>) attributes {dimension_semantics = [], scalar_prefetch = 0 : i64, scratch_operands = 0 : i64, tpu.core_type = #tpu.core_type<tc>} {
    %c0 = arith.constant 0 : index
    %c0_0 = arith.constant 0 : index
    %0 = vector.load %arg2[%c0, %c0_0] : memref<48x48xbf16, #tpu.memory_space<vmem>>, vector<48x48xbf16>
    %c0_1 = arith.constant 0 : index
    %c0_2 = arith.constant 0 : index
    %1 = vector.load %arg3[%c0_1, %c0_2] : memref<48x128xf32, #tpu.memory_space<vmem>>, vector<48x128xf32>
    %2 = arith.truncf %1 : vector<48x128xf32> to vector<48x128xbf16>
    %cst = arith.constant dense<0.000000e+00> : vector<48x128xf32>
    %3 = tpu.matmul %0, %2, %cst {dimension_numbers = #tpu.dot_dimension_numbers<[1], [0], [0], [1], [0, 0, 1, 1], [], []>} : vector<48x48xbf16>, vector<48x128xbf16>, vector<48x128xf32> -> vector<48x128xf32>
    %4 = arith.addf %1, %3 : vector<48x128xf32>
    %5 = arith.truncf %3 : vector<48x128xf32> to vector<48x128xbf16>
    %cst_3 = arith.constant dense<0.000000e+00> : vector<48x128xf32>
    %6 = tpu.matmul %0, %5, %cst_3 {dimension_numbers = #tpu.dot_dimension_numbers<[1], [0], [0], [1], [0, 0, 1, 1], [], []>} : vector<48x48xbf16>, vector<48x128xbf16>, vector<48x128xf32> -> vector<48x128xf32>
    %7 = arith.addf %4, %6 : vector<48x128xf32>
    %8 = arith.truncf %6 : vector<48x128xf32> to vector<48x128xbf16>
    %cst_4 = arith.constant dense<0.000000e+00> : vector<48x128xf32>
    %9 = tpu.matmul %0, %8, %cst_4 {dimension_numbers = #tpu.dot_dimension_numbers<[1], [0], [0], [1], [0, 0, 1, 1], [], []>} : vector<48x48xbf16>, vector<48x128xbf16>, vector<48x128xf32> -> vector<48x128xf32>
    %10 = arith.addf %7, %9 : vector<48x128xf32>
    %cst_5 = arith.constant 2.500000e-01 : f32
    %11 = vector.broadcast %cst_5 : f32 to vector<48x128xf32>
    %12 = arith.mulf %10, %11 : vector<48x128xf32>
    %c0_6 = arith.constant 0 : index
    %c0_7 = arith.constant 0 : index
    %13 = vector.load %arg4[%c0_6, %c0_7] : memref<48x128xf32, #tpu.memory_space<vmem>>, vector<48x128xf32>
    tpu.vector_store %arg4[%c0_6, %c0_7], %12 {strides = array<i32>} : memref<48x128xf32, #tpu.memory_space<vmem>>, vector<48x128xf32>,
    %14 = tpu.iota {dimensions = array<i32: 1>} : vector<8x48xi32>
    %c0_8 = arith.constant 0 : index
    %c0_9 = arith.constant 0 : index
    %15 = vector.load %arg0[%c0_8, %c0_9] : memref<8x1xi32, #tpu.memory_space<vmem>>, vector<8x1xi32>
    %16 = vector.broadcast %15 : vector<8x1xi32> to vector<8x48xi32>
    %17 = arith.cmpi eq, %14, %16 : vector<8x48xi32>
    %cst_10 = arith.constant 1.000000e+00 : f32
    %cst_11 = arith.constant 0.000000e+00 : f32
    %18 = vector.broadcast %cst_10 : f32 to vector<8x48xf32>
    %19 = vector.broadcast %cst_11 : f32 to vector<8x48xf32>
    %20 = arith.select %17, %18, %19 : vector<8x48xi1>, vector<8x48xf32>
    %c0_12 = arith.constant 0 : index
    %c0_13 = arith.constant 0 : index
    %21 = vector.load %arg1[%c0_12, %c0_13] : memref<8x1xi32, #tpu.memory_space<vmem>>, vector<8x1xi32>
    %c16_i32 = arith.constant 16 : i32
    %22 = vector.broadcast %c16_i32 : i32 to vector<8x1xi32>
    %23 = arith.addi %21, %22 : vector<8x1xi32>
    %24 = vector.broadcast %23 : vector<8x1xi32> to vector<8x48xi32>
    %25 = arith.cmpi eq, %14, %24 : vector<8x48xi32>
    %cst_14 = arith.constant 1.000000e+00 : f32
    %cst_15 = arith.constant 0.000000e+00 : f32
    %26 = vector.broadcast %cst_14 : f32 to vector<8x48xf32>
    %27 = vector.broadcast %cst_15 : f32 to vector<8x48xf32>
    %28 = arith.select %25, %26, %27 : vector<8x48xi1>, vector<8x48xf32>
    %cst_16 = arith.constant dense<0.000000e+00> : vector<8x128xf32>
    %29 = tpu.matmul %20, %12, %cst_16 {dimension_numbers = #tpu.dot_dimension_numbers<[1], [0], [0], [1], [0, 0, 1, 1], [], []>} : vector<8x48xf32>, vector<48x128xf32>, vector<8x128xf32> -> vector<8x128xf32>
    %cst_17 = arith.constant dense<0.000000e+00> : vector<8x128xf32>
    %30 = tpu.matmul %28, %12, %cst_17 {dimension_numbers = #tpu.dot_dimension_numbers<[1], [0], [0], [1], [0, 0, 1, 1], [], []>} : vector<8x48xf32>, vector<48x128xf32>, vector<8x128xf32> -> vector<8x128xf32>
    %31 = arith.mulf %29, %30 : vector<8x128xf32>
    %cst_18 = arith.constant dense<0.000000e+00> : vector<8xf32>
    %32 = vector.multi_reduction <add>, %31, %cst_18 [1] : vector<8x128xf32> to vector<8xf32>
    %33 = vector.shape_cast %32 : vector<8xf32> to vector<8x1xf32>
    %c0_19 = arith.constant 0 : index
    %c0_20 = arith.constant 0 : index
    %34 = vector.load %arg5[%c0_19, %c0_20] : memref<8x1xf32, #tpu.memory_space<vmem>>, vector<8x1xf32>
    tpu.vector_store %arg5[%c0_19, %c0_20], %33 {strides = array<i32>} : memref<8x1xf32, #tpu.memory_space<vmem>>, vector<8x1xf32>,
    return
  }
}

</mosaic_0001>

<bundles_post_ra>
// kernel: tpu_custom_call.1
= control target key start
LH: loop header
LB: loop body
LE: loop exit
PB: predicated region body
PF: predicated region fallthrough
CT: control target
= control target key end

     0   :  { %11 = vsyncpa [#allocation3], 0  ;;  %s838_s0 = inlined_call_operand.vmem [shape: s32[8,1], index: 0, kind: input, shape index: {}]   ;;  %s839_s1 = inlined_call_operand.vmem [shape: s32[8,1], index: 1, kind: input, shape index: {}]   ;;  %s840_s2 = inlined_call_operand.vmem [shape: bf16[48,48], index: 2, kind: input, shape index: {}]   ;;  %s841_s3 = inlined_call_operand.hbm [shape: f32[48,128], index: 3, kind: input, shape index: {}]   ;;  %s842_s4 = inlined_call_operand.hbm [shape: f32[48,128], index: 4, kind: output, shape index: {0}]   ;;  %s843_s5 = inlined_call_operand.vmem [shape: f32[8,1], index: 5, kind: output, shape index: {1}]  }
   0x1   :  { %12 = vsyncpa [#allocation4], 0  ;;  %s677_s18 = smov [#allocation2]   ;;  %s629_s22 = scalar_lea.hbm %s841_s3, 768 }
   0x2   :  { %s24_s19 = sshll.u32 %s677_s18, 4  ;;  %p630_p0 = scmp.ne.s32.totalorder %s841_s3, %s629_s22  ;;  %s25_s19 = int_to_ptr.vmem [resolvable:$true] %s24_s19 }
   0x3   :  { %p633_p1 = scmp.lt.u32.totalorder %s629_s22, %s841_s3 }
   0x5   :  { %p635_p2 = pnand %p633_p1, %p630_p0 }
   0x7   :  { %638 = shalt.err (!%p635_p2)
}
   0x8   :  { %s639_s27 = scalar_lea.vmem %s25_s19, 768  ;;  %p644_p4 = scmp.lt.s32.totalorder %s25_s19, %s25_s19 }
   0x9   :  { %p640_p3 = scmp.ne.s32.totalorder %s25_s19, %s639_s27  ;;  %p645_p5 = scmp.lt.s32.totalorder %s639_s27, %s639_s27 }
   0xb   :  { %p646_p6 = por %p645_p5, %p644_p4 }
   0xd   :  { %p647_p7 = pnand %p646_p6, %p640_p3 }
   0xf   :  { %650 = shalt.err (!%p647_p7)
}
  0x10   :  { %s678_s28 = smov 128   ;;  %s679_s29 = smov 8  }
  0x11   :  { %30 = dma.hbm_to_vmem [thread:$0]  %s841_s3, 768, %s25_s19, [#allocation3], %s678_s28, %s678_s28, %s679_s29  }
  0x12   :  { %673 = dma.done.wait [#allocation3], 768  }
  0x13   :  { %674 = vsyncadd [#allocation3], 4294966528  ;;  %v680_v0 = vmov 0.0   ;;  %vm681_vm0 = vmmov 0   ;;  %v41_v1 = vld [vmem:[#allocation2] sm:$0xff]  ;;  %v42_v2 = vld [vmem:[#allocation2 + $0x8] sm:$0xff] }
  0x14   :  { %515 = vmatprep.subr.bf16.mxu0 %v680_v0  ;;  %521 = vmatprep.mubr.msk.bf16.mxu0 %vm681_vm0, %v680_v0  ;;  %v736_v3 = vld [vmem:[#allocation2 + $0x10] sm:$0xff]  ;;  %v47_v4 = vpack.c.bf16 %v42_v2, %v41_v1  ;;  %v738_v5 = vld [vmem:[#allocation2 + $0x18] sm:$0xff]  ;;  %v742_v7 = vld [vmem:[#allocation2 + $0x20] sm:$0xff]  ;;  %vm65_vm1 = vcmask 392192   ;;  %v682_v30 = vmov 0   ;;  %v683_v59 = vmov 0.0|0.0  }
  0x15   :  { %533 = vmatprep.subr.bf16.mxu1 %v680_v0  ;;  %539 = vmatprep.mubr.msk.bf16.mxu1 %vm681_vm0, %v680_v0  ;;  %v48_v6 = vpack.c.bf16 %v738_v5, %v736_v3  ;;  %v745_v8 = vld [vmem:[#allocation2 + $0x28] sm:$0xff]  ;;  %v753_v10 = vld [vmem:[%s840_s2] sm:$0xff]   ;;  %v772_v12 = vld [vmem:[%s840_s2 + $0x10] sm:$0xff]  }
  0x16   :  { %516 = vmatpush3.bf16.msra.mxu0 %v47_v4  ;;  %v49_v9 = vpack.c.bf16 %v745_v8, %v742_v7  ;;  %v763_v11 = vld [vmem:[%s840_s2 + $0x8] sm:$0xff]   ;;  %v284_v28 = vld [vmem:[%s838_s0] sm:$0xff]  ;;  %625 = vset.pattern.permute.xlu0 %v682_v30  ;;  %s684_s0 = smov [#allocation5]  }
  0x17   :  { %517 = vmatprep.subr.bf16.mxu0 %v680_v0  ;;  %v290_v29 = vld [vmem:[%s839_s1] sm:$0xff]  ;;  %286 = vperm.xlu0 %625, %v284_v28   ;;  %s453_s1 = sshll.u32 %s684_s0, 4  ;;  %s454_s1 = int_to_ptr.vmem [resolvable:$true] %s453_s1 }
  0x18   :  { %v291_v31 = vadd.s32 16, %v290_v29  ;;  %s651_s15 = scalar_lea.vmem %s454_s1, 768  ;;  %p656_p9 = scmp.lt.s32.totalorder %s454_s1, %s454_s1 }
  0x19   :  { %p652_p8 = scmp.ne.s32.totalorder %s454_s1, %s651_s15  ;;  %p657_p10 = scmp.lt.s32.totalorder %s651_s15, %s651_s15 }
  0x1a   :  { %518 = vmatpush3.bf16.msra.mxu0 %v48_v6 }
  0x1b   :  { %519 = vmatprep.subr.bf16.mxu0 %v680_v0  ;;  %293 = vperm.xlu0 %625, %v291_v31   ;;  %p658_p11 = por %p657_p10, %p656_p9 }
  0x1d   :  { %p659_p12 = pnand %p658_p11, %p652_p8 }
  0x1e   :  { %520 = vmatpush3.bf16.msra.mxu0 %v49_v9 }
  0x1f   :  { %551 = vmatprep.subr.bf16.mxu0 %v680_v0 }
  0x21   :  { %522 = vmatmul.mubr.msk.bf16.vlgmr.msra.gmra.mrb[0].mxu0 %vm65_vm1, %v753_v10 }
  0x22   :  { %525 = vmatprep.mubr.msk.bf16.mxu0 %vm681_vm0, %v680_v0 }
  0x29   :  { %526 = vmatmul.mubr.msk.bf16.gmra.mrb[4].mxu0 %vm65_vm1, %v763_v11 }
  0x2a   :  { %529 = vmatprep.mubr.msk.bf16.mxu0 %vm681_vm0, %v680_v0 }
  0x31   :  { %530 = vmatmul.mubr.msk.bf16.gmra.mrb[8].mxu0 %vm65_vm1, %v772_v12 }
  0x32   :  { %557 = vmatprep.mubr.msk.bf16.mxu0 %vm681_vm0, %v680_v0 }
  0xf4   :  { %v109_v13 = vpop.f32.mrb[0].mxu0 }
  0xf5   :  { %v523_v14 = vpop.f32.mrb[1].mxu0  ;;  %v132_v32 = vadd.f32 %v109_v13, %v41_v1 }
  0xf6   :  { %v112_v15 = vpop.f32.mrb[2].mxu0  ;;  %v282_v14 = vlaneseq }
  0xf7   :  { %v524_v16 = vpop.f32.mrb[3].mxu0  ;;  %v138_v17 = vpack.c.bf16 %v112_v15, %v109_v13  ;;  %v133_v34 = vadd.f32 %v112_v15, %v42_v2 }
  0xf9   :  { %534 = vmatpush3.bf16.msra.mxu1 %v138_v17 }
  0xfa   :  { %535 = vmatprep.subr.bf16.mxu1 %v680_v0 }
  0xfc   :  { %v117_v18 = vpop.f32.mrb[4].mxu0 }
  0xfd   :  { %v527_v19 = vpop.f32.mrb[5].mxu0  ;;  %v134_v41 = vadd.f32 %v117_v18, %v736_v3 }
  0xfe   :  { %v120_v20 = vpop.f32.mrb[6].mxu0 }
  0xff   :  { %v139_v21 = vpack.c.bf16 %v120_v20, %v117_v18  ;;  %v528_v22 = vpop.f32.mrb[7].mxu0  ;;  %v135_v43 = vadd.f32 %v120_v20, %v738_v5  ;;  %v283_v20 = vand.u32 127, %v282_v14 }
 0x101   :  { %536 = vmatpush3.bf16.msra.mxu1 %v139_v21 }
 0x102   :  { %537 = vmatprep.subr.bf16.mxu1 %v680_v0 }
 0x104   :  { %v125_v23 = vpop.f32.mrb[8].mxu0 }
 0x105   :  { %v531_v24 = vpop.f32.mrb[9].mxu0  ;;  %v136_v50 = vadd.f32 %v125_v23, %v742_v7 }
 0x106   :  { %v128_v25 = vpop.f32.mrb[10].mxu0 }
 0x107   :  { %v140_v26 = vpack.c.bf16 %v128_v25, %v125_v23  ;;  %v532_v27 = vpop.f32.mrb[11].mxu0  ;;  %v137_v52 = vadd.f32 %v128_v25, %v745_v8  ;;  %v287_v25 = vpop.permute.xlu0 %286 }
 0x108   :  { %vm288_vm2 = vcmp.eq.s32.totalorder %v283_v20, %v287_v25 }
 0x109   :  { %538 = vmatpush3.bf16.msra.mxu1 %v140_v26  ;;  %v289_v27 = vsel %vm288_vm2, 1.0, %v680_v0 }
 0x10a   :  { %599 = vmatprep.subr.bf16.mxu1 %v683_v59 }
 0x10b   :  { %v294_v28 = vpop.permute.xlu0 %293 }
 0x10c   :  { %540 = vmatmul.mubr.msk.bf16.vlgmr.msra.gmra.mrb[0].mxu1 %vm65_vm1, %v753_v10  ;;  %vm295_vm3 = vcmp.eq.s32.totalorder %v283_v20, %v294_v28 }
 0x10d   :  { %543 = vmatprep.mubr.msk.bf16.mxu1 %vm681_vm0, %v680_v0  ;;  %v296_v29 = vsel %vm295_vm3, 1.0, %v680_v0 }
 0x114   :  { %544 = vmatmul.mubr.msk.bf16.gmra.mrb[4].mxu1 %vm65_vm1, %v763_v11 }
 0x115   :  { %547 = vmatprep.mubr.msk.bf16.mxu1 %vm681_vm0, %v680_v0 }
 0x11c   :  { %548 = vmatmul.mubr.msk.bf16.gmra.mrb[8].mxu1 %vm65_vm1, %v772_v12 }
 0x11d   :  { %581 = vmatprep.mubr.msk.f32.mxu1 %vm681_vm0, %v680_v0 }
 0x1df   :  { %v175_v33 = vpop.f32.mrb[0].mxu1 }
 0x1e0   :  { %v198_v35 = vadd.f32 %v175_v33, %v132_v32  ;;  %v541_v36 = vpop.f32.mrb[1].mxu1 }
 0x1e1   :  { %v178_v37 = vpop.f32.mrb[2].mxu1 }
 0x1e2   :  { %v199_v38 = vadd.f32 %v178_v37, %v133_v34  ;;  %v204_v39 = vpack.c.bf16 %v178_v37, %v175_v33  ;;  %v542_v40 = vpop.f32.mrb[3].mxu1 }
 0x1e4   :  { %552 = vmatpush3.bf16.msra.mxu0 %v204_v39 }
 0x1e5   :  { %553 = vmatprep.subr.bf16.mxu0 %v680_v0 }
 0x1e7   :  { %v183_v42 = vpop.f32.mrb[4].mxu1 }
 0x1e8   :  { %v200_v44 = vadd.f32 %v183_v42, %v134_v41  ;;  %v545_v45 = vpop.f32.mrb[5].mxu1 }
 0x1e9   :  { %v186_v46 = vpop.f32.mrb[6].mxu1 }
 0x1ea   :  { %v201_v47 = vadd.f32 %v186_v46, %v135_v43  ;;  %v205_v48 = vpack.c.bf16 %v186_v46, %v183_v42  ;;  %v546_v49 = vpop.f32.mrb[7].mxu1 }
 0x1ec   :  { %554 = vmatpush3.bf16.msra.mxu0 %v205_v48 }
 0x1ed   :  { %555 = vmatprep.subr.bf16.mxu0 %v680_v0 }
 0x1ef   :  { %v191_v51 = vpop.f32.mrb[8].mxu1 }
 0x1f0   :  { %v202_v53 = vadd.f32 %v191_v51, %v136_v50  ;;  %v549_v54 = vpop.f32.mrb[9].mxu1 }
 0x1f1   :  { %v194_v55 = vpop.f32.mrb[10].mxu1 }
 0x1f2   :  { %v203_v56 = vadd.f32 %v194_v55, %v137_v52  ;;  %v206_v57 = vpack.c.bf16 %v194_v55, %v191_v51  ;;  %v550_v58 = vpop.f32.mrb[11].mxu1 }
 0x1f4   :  { %556 = vmatpush3.bf16.msra.mxu0 %v206_v57 }
 0x1f7   :  { %558 = vmatmul.mubr.msk.bf16.vlgmr.msra.gmra.mrb[12].mxu0 %vm65_vm1, %v753_v10 }
 0x1f8   :  { %561 = vmatprep.mubr.msk.bf16.mxu0 %vm681_vm0, %v680_v0 }
 0x1ff   :  { %562 = vmatmul.mubr.msk.bf16.gmra.mrb[16].mxu0 %vm65_vm1, %v763_v11 }
 0x200   :  { %565 = vmatprep.mubr.msk.bf16.mxu0 %vm681_vm0, %v680_v0 }
 0x207   :  { %566 = vmatmul.mubr.msk.bf16.gmra.mrb[20].mxu0 %vm65_vm1, %v772_v12 }
 0x2ca   :  { %v241_v60 = vpop.f32.mrb[12].mxu0 }
 0x2cb   :  { %v264_v61 = vadd.f32 %v241_v60, %v198_v35  ;;  %v559_v62 = vpop.f32.mrb[13].mxu0 }
 0x2cc   :  { %v244_v63 = vpop.f32.mrb[14].mxu0 }
 0x2cd   :  { %v270_v1 = vmul.f32 0.25, %v264_v61  ;;  %v265_v2 = vadd.f32 %v244_v63, %v199_v38  ;;  %v560_v3 = vpop.f32.mrb[15].mxu0 }
 0x2cf   :  { %276 = vst [vmem:[#allocation5] sm:$0xff] %v270_v1  ;;  %v271_v4 = vmul.f32 0.25, %v265_v2 }
 0x2d1   :  { %277 = vst [vmem:[#allocation5 + $0x8] sm:$0xff] %v271_v4  ;;  %v600_v5 = vpack.c.bf16 %v271_v4, %v270_v1 }
 0x2d2   :  { %v249_v6 = vpop.f32.mrb[16].mxu0 }
 0x2d3   :  { %v266_v7 = vadd.f32 %v249_v6, %v200_v44  ;;  %v563_v8 = vpop.f32.mrb[17].mxu0  ;;  %601 = vmatpush3.bf16.msra.mxu1 %v600_v5 }
 0x2d4   :  { %v252_v9 = vpop.f32.mrb[18].mxu0  ;;  %602 = vmatprep.subr.bf16.mxu1 %v683_v59 }
 0x2d5   :  { %v272_v10 = vmul.f32 0.25, %v266_v7  ;;  %v267_v11 = vadd.f32 %v252_v9, %v201_v47  ;;  %v564_v12 = vpop.f32.mrb[19].mxu0 }
 0x2d7   :  { %278 = vst [vmem:[#allocation5 + $0x10] sm:$0xff] %v272_v10  ;;  %v273_v13 = vmul.f32 0.25, %v267_v11 }
 0x2d9   :  { %279 = vst [vmem:[#allocation5 + $0x18] sm:$0xff] %v273_v13  ;;  %v603_v15 = vpack.c.bf16 %v273_v13, %v272_v10 }
 0x2da   :  { %v257_v16 = vpop.f32.mrb[20].mxu0 }
 0x2db   :  { %v268_v17 = vadd.f32 %v257_v16, %v202_v53  ;;  %v567_v18 = vpop.f32.mrb[21].mxu0  ;;  %604 = vmatpush3.bf16.msra.mxu1 %v603_v15 }
 0x2dc   :  { %v260_v19 = vpop.f32.mrb[22].mxu0  ;;  %605 = vmatprep.subr.bf16.mxu1 %v683_v59 }
 0x2dd   :  { %v274_v21 = vmul.f32 0.25, %v268_v17  ;;  %v269_v22 = vadd.f32 %v260_v19, %v203_v56  ;;  %v568_v23 = vpop.f32.mrb[23].mxu0 }
 0x2df   :  { %280 = vst [vmem:[#allocation5 + $0x20] sm:$0xff] %v274_v21  ;;  %v275_v24 = vmul.f32 0.25, %v269_v22 }
 0x2e1   :  { %281 = vst [vmem:[#allocation5 + $0x28] sm:$0xff] %v275_v24  ;;  %v606_v26 = vpack.c.bf16 %v275_v24, %v274_v21 }
 0x2e3   :  { %607 = vmatpush3.bf16.msra.mxu1 %v606_v26 }
 0x2e4   :  { %608 = vmatprep.subr.bf16.mxu1 %v683_v59 }
 0x2e6   :  { %582 = vmatmul.mubr.msk.f32.vlgmr.msra.gmra.mrb[12].mxu1 %vm65_vm1, %v289_v27 }
 0x2e7   :  { %610 = vmatpush3.bf16.msra.mxu1 %v600_v5  ;;  %596 = vmatprep.mubr.msk.f32.mxu1 %vm681_vm0, %v680_v0 }
 0x2e8   :  { %611 = vmatprep.subr.bf16.mxu1 %v683_v59 }
 0x2eb   :  { %613 = vmatpush3.bf16.msra.mxu1 %v603_v15 }
 0x2ec   :  { %614 = vmatprep.subr.bf16.mxu1 %v683_v59 }
 0x2ef   :  { %616 = vmatpush3.bf16.msra.mxu1 %v606_v26 }
 0x2f2   :  { %597 = vmatmul.mubr.msk.f32.vlgmr.msra.gmra.mrb[14].mxu1 %vm65_vm1, %v296_v29 }
 0x3b9   :  { %v366_v30 = vpop.f32.mrb[12].mxu1 }
 0x3ba   :  { %v583_v31 = vpop.f32.mrb[13].mxu1 }
 0x3c5   :  { %v439_v32 = vpop.f32.mrb[14].mxu1 }
 0x3c6   :  { %v598_v33 = vpop.f32.mrb[15].mxu1  ;;  %v443_v34 = vmul.f32 %v439_v32, %v366_v30 }
 0x3c8   :  { %444 = vadd.xlane.f32.xlu1 %v443_v34 }
 0x3c9   :  { %662 = shalt.err (!%p659_p12)
}
 0x3ca   :  { %s663_s18 = scalar_lea.hbm %s842_s4, 768 }
 0x3cb   :  { %p664_p13 = scmp.ne.s32.totalorder %s842_s4, %s663_s18  ;;  %p667_p0 = scmp.lt.u32.totalorder %s663_s18, %s842_s4 }
 0x3cd   :  { %p669_p1 = pnand %p667_p0, %p664_p13 }
 0x3cf   :  { %672 = shalt.err (!%p669_p1)
}
 0x3d0   :  { %459 = dma.vmem_to_hbm [thread:$0]  %s454_s1, 768, %s842_s4, [#allocation4], %s678_s28, %s678_s28, %s679_s29   ;;  %vm446_vm4 = vcmask 7168  }
 0x455   :  { %v445_v0 = vpop.xlane.xlu1 %444 }
 0x456   :  { %447 = vst.msk [vmem:[%s843_s5] sm:$0xff] %vm446_vm4, %v445_v0 }
 0x457   :  { %675 = dma.done.wait [#allocation4], 768  }
 0x458   :  { %676 = vsyncadd [#allocation4], 4294966528 }
 0x459   :  { %467 = vsyncpa [#allocation3], 1 }
 0x45a   :  { %468 = vsyncpa [#allocation4], 1 }

</bundles_post_ra>
